<compile_context>
chip_gen: v5e
topology: v5e:2x2
jax: 0.10.0
libtpu: 0.0.40
codegen_flags: <defaults>
</compile_context>

<pallas_src>
import functools

import jax
import jax.numpy as jnp
from jax.experimental import pallas as pl
from jax.experimental.pallas import tpu as pltpu

EPS = 1e-8
_LANE = 128  # keep spatial tiles lane-dense (unmasked vst on interior blocks)


def _round_up(a, b):
    return ((a + b - 1) // b) * b


def _pixelnorm_kernel(x_ref, o_ref, *, inv_c):
    # x_ref block: (C, THW) -- the leading batch dim is squeezed out.
    x = x_ref[...]
    xf = x.astype(jnp.float32)
    # sum * (1/C) instead of mean: one XLU sublane-reduce + one VPU scale.
    ss = jnp.sum(xf * xf, axis=0, keepdims=True) * inv_c        # (1, THW) f32
    inv = jax.lax.rsqrt(ss + EPS)                                # EUP (free slot)
    if x_ref.dtype == jnp.float32:
        o_ref[...] = xf * inv
    else:
        # Keep the normalize multiply in the narrow dtype: halves vreg
        # pressure and avoids storing a full f32 copy of the block.
        o_ref[...] = (x * inv.astype(x.dtype)).astype(o_ref.dtype)


def _pixel_norm_xla(x):
    """Plain-XLA fallback for tiny-C layers (sublane padding tax > kernel win)."""
    xf = x.astype(jnp.float32)
    inv = jax.lax.rsqrt(jnp.mean(xf * xf, axis=1, keepdims=True) + EPS)
    return (xf * inv).astype(x.dtype)


def _vmem_budgets():
    """(buffer_budget_bytes, vmem_limit_bytes), gated on chip generation."""
    try:
        phys = int(pltpu.get_tpu_info().vmem_capacity_bytes)
    except Exception:
        phys = 64 * 1024 * 1024  # assume the smallest (v7x-like) if query fails
    if phys >= 128 * 1024 * 1024:            # v5e / v6e: plenty of headroom
        return 64 * 1024 * 1024, 96 * 1024 * 1024
    return 24 * 1024 * 1024, 32 * 1024 * 1024  # v7x: 64 MiB physical, stay safe


def _choose_thw(C, HW, itemsize, buffer_budget):
    """Largest lane-dense spatial tile that keeps all live buffers in budget.

    Live bytes per (channel, column) element:
      in + out blocks, each double-buffered        -> 4 * itemsize
      + f32 temporaries from the in-kernel upcast  -> ~8 B for sub-32-bit dtypes
    """
    bytes_per_elem = 4 * itemsize + (8 if itemsize < 4 else 0)
    max_cols = buffer_budget // (bytes_per_elem * C)
    max_cols = max(_LANE, (max_cols // _LANE) * _LANE)
    if HW <= max_cols:
        return HW        # single spatial block == full dim (always legal)
    return max_cols      # multiple of 128; ragged last block is masked


def pixel_norm(x):
    """x: (N, C, H, W) -> x / sqrt(mean(x**2, dim=1, keepdim=True) + 1e-8)."""
    N, C, H, W = x.shape
    HW = H * W
    itemsize = jnp.dtype(x.dtype).itemsize

    # Tiny-C: the (C, THW) block would be mostly sublane padding (C < 8 fp32,
    # < 16 bf16, < 32 int8/fp8); XLA's fused elementwise is faster there.
    if C < 32 // itemsize:
        return _pixel_norm_xla(x)

    buffer_budget, vmem_limit = _vmem_budgets()
    thw = _choose_thw(C, HW, itemsize, buffer_budget)
    n_s = pl.cdiv(HW, thw)
    if N * n_s < 2 and HW > _LANE:
        # Ensure >= 2 grid steps so both v7x TensorCores get work.
        thw = _round_up(-(-HW // 2), _LANE)
        n_s = pl.cdiv(HW, thw)

    x3 = x.reshape(N, C, HW)  # contiguous collapse: free, no HBM pass

    out3 = pl.pallas_call(
        functools.partial(_pixelnorm_kernel, inv_c=1.0 / C),
        out_shape=jax.ShapeDtypeStruct((N, C, HW), x.dtype),
        grid_spec=pltpu.PrefetchScalarGridSpec(
            num_scalar_prefetch=0,
            grid=(N, n_s),
            in_specs=[pl.BlockSpec((None, C, thw), lambda n, s: (n, 0, s))],
            out_specs=pl.BlockSpec((None, C, thw), lambda n, s: (n, 0, s)),
        ),
        compiler_params=pltpu.CompilerParams(
            dimension_semantics=("parallel", "parallel"),
            vmem_limit_bytes=vmem_limit,
        ),
        cost_estimate=pl.CostEstimate(
            flops=3 * N * C * HW,
            transcendentals=N * HW,
            bytes_accessed=2 * N * C * HW * itemsize,
        ),
    )(x3)

    return out3.reshape(N, C, H, W)


if __name__ == "__main__":
    key = jax.random.PRNGKey(0)
    k1, k2, k3, k4 = jax.random.split(key, 4)

    def ref_fn(v):
        vf = v.astype(jnp.float32)
        return (vf / jnp.sqrt(jnp.mean(vf * vf, axis=1, keepdims=True) + EPS)
                ).astype(v.dtype)

    # 1) Spec shape (C=4 < sublane packing -> tiny-C XLA dispatch path).
    x1 = jax.random.normal(k1, (2, 4, 16, 16), dtype=jnp.float32)
    # 2) Pallas kernel path, single full-width spatial block per batch.
    x2 = jax.random.normal(k2, (2, 16, 16, 16), dtype=jnp.float32)
    # 3) Pallas kernel path, N=1 with non-multiple HW: exercises the ragged
    #    (masked) last block and the v7x two-TensorCore grid split.
    x3 = jax.random.normal(k3, (1, 16, 13, 13), dtype=jnp.float32)
    # 4) bf16 path (f32 channel accumulation, bf16 normalize/store).
    x4 = jax.random.normal(k4, (2, 32, 16, 16), dtype=jnp.bfloat16)

    for x, tol in ((x1, 1e-5), (x2, 1e-5), (x3, 1e-5), (x4, 3e-2)):
        out = jax.block_until_ready(pixel_norm(x))
        ref = ref_fn(x)
        assert out.shape == x.shape and out.dtype == x.dtype
        assert jnp.allclose(out.astype(jnp.float32), ref.astype(jnp.float32),
                            atol=tol, rtol=tol), f"mismatch at shape {x.shape}"

    print("KERNEL_OK")
</pallas_src>

<mosaic_0001>
module attributes {stable_mosaic.version = 11 : i64} {
  func.func @_pixelnorm_kernel(%arg0: i32, %arg1: i32, %arg2: memref<1x16x256xf32, #tpu.memory_space<vmem>>, %arg3: memref<1x16x256xf32, #tpu.memory_space<vmem>>) attributes {dimension_semantics = [#tpu.dimension_semantics<parallel>, #tpu.dimension_semantics<parallel>], iteration_bounds = array<i64: 2, 1>, scalar_prefetch = 0 : i64, scratch_operands = 0 : i64, tpu.core_type = #tpu.core_type<tc>, window_params = [{transform_indices = @transform_0, window_bounds = array<i64: 1, 16, 256>}, {transform_indices = @transform_1, window_bounds = array<i64: 1, 16, 256>}]} {
    %c0 = arith.constant 0 : index
    %c0_0 = arith.constant 0 : index
    %c0_1 = arith.constant 0 : index
    %0 = vector.load %arg2[%c0, %c0_0, %c0_1] : memref<1x16x256xf32, #tpu.memory_space<vmem>>, vector<1x16x256xf32>
    %1 = vector.shape_cast %0 : vector<1x16x256xf32> to vector<16x256xf32>
    %2 = arith.mulf %1, %1 : vector<16x256xf32>
    %cst = arith.constant dense<0.000000e+00> : vector<256xf32>
    %3 = vector.multi_reduction <add>, %2, %cst [0] : vector<16x256xf32> to vector<256xf32>
    %4 = vector.shape_cast %3 : vector<256xf32> to vector<1x256xf32>
    %cst_2 = arith.constant 6.250000e-02 : f32
    %5 = vector.broadcast %cst_2 : f32 to vector<1x256xf32>
    %6 = arith.mulf %4, %5 : vector<1x256xf32>
    %cst_3 = arith.constant 9.99999993E-9 : f32
    %7 = vector.broadcast %cst_3 : f32 to vector<1x256xf32>
    %8 = arith.addf %6, %7 : vector<1x256xf32>
    %9 = math.rsqrt %8 : vector<1x256xf32>
    %10 = vector.broadcast %9 : vector<1x256xf32> to vector<16x256xf32>
    %11 = arith.mulf %1, %10 : vector<16x256xf32>
    %c0_4 = arith.constant 0 : index
    %c0_5 = arith.constant 0 : index
    %c0_6 = arith.constant 0 : index
    %12 = vector.load %arg3[%c0_4, %c0_5, %c0_6] : memref<1x16x256xf32, #tpu.memory_space<vmem>>, vector<1x16x256xf32>
    %13 = vector.shape_cast %12 : vector<1x16x256xf32> to vector<16x256xf32>
    %14 = vector.shape_cast %11 : vector<16x256xf32> to vector<1x16x256xf32>
    tpu.vector_store %arg3[%c0_4, %c0_5, %c0_6], %14 {strides = array<i32>} : memref<1x16x256xf32, #tpu.memory_space<vmem>>, vector<1x16x256xf32>,
    return
  }
  func.func @transform_0(%arg0: i32, %arg1: i32) -> (i32, i32, i32) {
    %c0_i32 = arith.constant 0 : i32
    %c0_i32_0 = arith.constant 0 : i32
    return %arg0, %c0_i32, %arg1 : i32, i32, i32
  }
  func.func @transform_1(%arg0: i32, %arg1: i32) -> (i32, i32, i32) {
    %c0_i32 = arith.constant 0 : i32
    %c0_i32_0 = arith.constant 0 : i32
    return %arg0, %c0_i32, %arg1 : i32, i32, i32
  }
}

</mosaic_0001>

<bundles_post_ra>
// kernel: tpu_custom_call.1
= control target key start
LH: loop header
LB: loop body
LE: loop exit
PB: predicated region body
PF: predicated region fallthrough
CT: control target
= control target key end

     0   :  { %6 = vsyncpa [#allocation3], 0  ;;  %s655_s0 = inlined_call_operand.hbm [shape: f32[2,16,256], index: 0, kind: input, shape index: {}]   ;;  %s656_s1 = inlined_call_operand.hbm [shape: f32[2,16,256], index: 1, kind: output, shape index: {}]  }
   0x1   :  { %8 = vsyncpa [#allocation3 + $0x1], 0 }
   0x2   :  { %9 = vsyncpa [#allocation4], 0 }
   0x3   :  { %11 = vsyncpa [#allocation4 + $0x1], 0  ;;  %s531_s6 = smov 0   ;;  %s533_s7 = smov 0  }
   0x4   :  { %s535_s8 = smov 0   ;;  %s537_s9 = smov 0  }
   0x5   :  { %s539_s10 = smov 0   ;;  %s541_s11 = smov 0  }
   0x6 LB: > { %s316_s12 = sadd.s32 4294967295, %s515_s11   ;;  %s317_s13 = sadd.s32 4294967294, %s515_s11   ;;  %s515_s11 = sphi %s541_s11, %s17_s11   ;;  %s511_s10 = sphi %s539_s10, %s665_s10   ;;  %s507_s9 = sphi %s537_s9, %s664_s9   ;;  %s503_s8 = sphi %s535_s8, %s663_s8   ;;  %s499_s7 = sphi %s533_s7, %s662_s7   ;;  %s495_s6 = sphi %s531_s6, %s661_s6  }
   0x7   : > { %s29_s14 = sadd.s32 1, %s511_s10  ;;  %s38_s15 = sadd.s32 1, %s503_s8 }
   0x8   : > { %p31_p0 = scmp.ge.s32.totalorder %s29_s14, 2  ;;  %p45_p1 = scmp.ne.s32.totalorder %s503_s8, %s499_s7 }
   0x9   : > { %p46_p2 = scmp.eq.s32.totalorder %s515_s11, 0  ;;  %p51_p3 = scmp.ne.s32.totalorder %s499_s7, %s495_s6 }
   0xa   : > { %s667_s14 = smov (%p31_p0, %s29_s14), 0  ;;  %p52_p5 = scmp.eq.s32.totalorder %s316_s12, 0 }
   0xb   : > { %p572_p4 = por %p46_p2, %p45_p1  ;;  %s33_s17 = ssub.s32 %s511_s10, %s667_s14 }
   0xc   : > { %p77_p6 = scmp.eq.s32.totalorder %s316_s12, 1  ;;  %p36_p7 = scmp.eq.s32.totalorder %s33_s17, 0 }
   0xd   : > { %p578_p8 = por %p52_p5, %p51_p3  ;;  %p83_p10 = scmp.eq.s32.totalorder %s317_s13, 1 }
   0xe   : > { %p582_p9 = por %p77_p6, %p45_p1  ;;  %p319_p12 = scmp.ge.s32.totalorder %s515_s11, 2 }
   0xf   : > { %s587_s20 = scalar_select %p36_p7, %s503_s8, %s38_s15  }
  0x10   : > { %p589_p11 = por %p83_p10, %p51_p3  ;;  %p345_p13 = scmp.lt.s32.totalorder %s515_s11, 2 }
  0x11   : > { %s103_s22 = sand.u32 1, %s503_s8   ;;  %s331_s24 = sshll.u32 %s511_s10, 5 }
  0x12   : > { %s320_s23 = sshll.u32 %s103_s22, 5  ;;  %s114_s27 = scalar_lea.hbm %s655_s0, %s331_s24 }
  0x13   : > { %s107_s28 = scalar_lea.vmem [#allocation2], %s320_s23  ;;  %s115_s30 = sshll.u32 %s114_s27, 4  ;;  %s116_s30 = int_to_ptr.hbm [resolvable:$true] %s115_s30 }
  0x14   : > { %s117_s29 = sshll.u32 %s107_s28, 4  ;;  %p338_p0 = pnand %p345_p13, %p572_p4  ;;  %s118_s29 = int_to_ptr.vmem [resolvable:$true] %s117_s29 }
  0x15   : > { %p323_p1 = scmp.ge.s32.totalorder %s515_s11, 1  ;;  %s104_s2 = scalar_lea.sflag [#allocation3], %s103_s22 }
  0x16   : > { %s517_s3 = smov 256   ;;  %s518_s4 = smov 16  }
  0x17   : > { %340 = dma.hbm_to_vmem [thread:$0]  (!%p338_p0), %s116_s30, 512, %s118_s29, %s104_s2, %s517_s3, %s517_s3, %s518_s4  }
  0x18   : > { %p125_p2 = scmp.lt.s32.totalorder %s515_s11, 3 }
  0x1a   : > { %p126_p3 = pnand %p323_p1, %p125_p2 }
  0x1b   : > { %s605_s5 = sand.u32 (!%p126_p3), 1, %s499_s7  }
  0x1c   : > { %129 = sbr.rel (%p126_p3) target bundleno = 82 (0x52), region = 24  ;;  %s324_s12 = sshll.u32 (!%p126_p3), %s605_s5, 5 }
  0x1d   : > { %s132_s13 = scalar_lea.sflag (!%p126_p3), [#allocation3], %s605_s5  ;;  %s135_s15 = scalar_lea.vmem (!%p126_p3), [#allocation2], %s324_s12 }
  0x21   : > { %486 = dma.done.wait (%p578_p8), %s132_s13, 512  }
  0x22   : > { %488 = vsyncadd (%p578_p8), %s132_s13, 4294966784  ;;  %v157_v0 = vld [vmem:[%s135_s15] sm:$0xff]  ;;  %v159_v1 = vld [vmem:[%s135_s15 + $0x10] sm:$0xff]  ;;  %s332_s16 = sshll.u32 %s507_s9, 5  ;;  %s154_s23 = scalar_lea.vmem [#allocation5], %s324_s12 }
  0x23   : > { %v158_v2 = vld [vmem:[%s135_s15 + $0x8] sm:$0xff]  ;;  %v161_v3 = vmul.f32 %v157_v0, %v157_v0  ;;  %v163_v4 = vmul.f32 %v159_v1, %v159_v1  ;;  %v160_v5 = vld [vmem:[%s135_s15 + $0x18] sm:$0xff]  ;;  %s225_s22 = scalar_lea.hbm %s656_s1, %s332_s16  ;;  %s226_s24 = sshll.u32 %s154_s23, 4  ;;  %s227_s24 = int_to_ptr.vmem [resolvable:$true] %s226_s24 }
  0x24   : > { %v162_v6 = vmul.f32 %v158_v2, %v158_v2  ;;  %v164_v7 = vmul.f32 %v160_v5, %v160_v5  ;;  %s228_s9 = sshll.u32 %s225_s22, 4  ;;  %s212_s25 = scalar_lea.sflag [#allocation4], %s605_s5  ;;  %s229_s9 = int_to_ptr.hbm [resolvable:$true] %s228_s9 }
  0x25   : > { %v165_v8 = vadd.f32 %v163_v4, %v161_v3  ;;  %s447_s26 = sshra.s32 %s229_s9, 4  ;;  %s453_s30 = scalar_lea.hbm %s656_s1, 64  ;;  %s448_s26 = int_to_ptr.hbm [resolvable:$true] %s447_s26 }
  0x26   : > { %v172_v9 = vadd.f32 %v164_v7, %v162_v6  ;;  %s449_s27 = scalar_lea.hbm %s448_s26, 32  ;;  %p454_p7 = scmp.lt.s32.totalorder %s448_s26, %s656_s1 }
  0x27   : > { %v166_v10 = vrot.slane %v165_v8, 4  ;;  %p450_p4 = scmp.ne.s32.totalorder %s448_s26, %s449_s27  ;;  %p455_p8 = scmp.lt.s32.totalorder %s453_s30, %s449_s27 }
  0x28   : > { %v173_v11 = vrot.slane %v172_v9, 4 }
  0x29   : > { %v167_v12 = vadd.f32 %v166_v10, %v165_v8  ;;  %p451_p5 = pnand %p450_p4, %p582_p9  ;;  %p456_p10 = por %p455_p8, %p454_p7 }
  0x2a   : > { %v174_v13 = vadd.f32 %v173_v11, %v172_v9 }
  0x2b   : > { %v168_v14 = vrot.slane %v167_v12, 2  ;;  %p452_p6 = pneg %p451_p5 }
  0x2c   : > { %v175_v15 = vrot.slane %v174_v13, 2 }
  0x2d   : > { %v169_v16 = vadd.f32 %v168_v14, %v167_v12  ;;  %p457_p13 = pnand %p456_p10, %p452_p6 }
  0x2e   : > { %v176_v17 = vadd.f32 %v175_v15, %v174_v13 }
  0x2f   : > { %v170_v18 = vrot.slane %v169_v16, 1 }
  0x30   : > { %v177_v19 = vrot.slane %v176_v17, 1 }
  0x31   : > { %v171_v20 = vadd.f32 %v170_v18, %v169_v16 }
  0x32   : > { %v178_v21 = vadd.f32 %v177_v19, %v176_v17 }
  0x33   : > { %v179_v22 = vmul.f32 0.0625, %v171_v20 }
  0x34   : > { %v180_v23 = vmul.f32 0.0625, %v178_v21 }
  0x35   : > { %v181_v24 = vadd.f32 1e-08, %v179_v22 }
  0x36   : > { %v182_v25 = vadd.f32 1e-08, %v180_v23 }
  0x37   : > { %399 = vrsqrt.f32 %v181_v24  ;;  %vm189_vm0 = vweird.f32 %v181_v24 }
  0x38   : > { %401 = vrsqrt.f32 %v182_v25  ;;  %vm199_vm2 = vweird.f32 %v182_v25 }
  0x3d   : > { %v400_v26 = vpop.eup %399 }
  0x3e   : > { %v402_v27 = vpop.eup %401  ;;  %v184_v28 = vmul.f32 %v400_v26, %v181_v24  ;;  %vm190_vm1 = vweird.f32 %v400_v26 }
  0x3f   : > { %v194_v29 = vmul.f32 %v402_v27, %v182_v25  ;;  %vm200_vm3 = vweird.f32 %v402_v27  ;;  %vm191_vm4 = vmor %vm189_vm0, %vm190_vm1 }
  0x40   : > { %v185_v30 = vmul.f32 %v400_v26, %v184_v28  ;;  %vm201_vm5 = vmor %vm199_vm2, %vm200_vm3 }
  0x41   : > { %v195_v31 = vmul.f32 %v402_v27, %v194_v29 }
  0x42   : > { %v186_v32 = vmul.f32 0.5, %v185_v30 }
  0x43   : > { %v196_v33 = vmul.f32 0.5, %v195_v31 }
  0x44   : > { %v187_v34 = vsub.f32 1.5, %v186_v32 }
  0x45   : > { %v197_v35 = vsub.f32 1.5, %v196_v33 }
  0x46   : > { %v188_v36 = vmul.f32 %v400_v26, %v187_v34 }
  0x47   : > { %v198_v37 = vmul.f32 %v402_v27, %v197_v35 }
  0x48   : > { %v192_v38 = vsel %vm191_vm4, %v400_v26, %v188_v36 }
  0x49   : > { %v203_v39 = vmul.f32 %v192_v38, %v157_v0  ;;  %v202_v40 = vsel %vm201_vm5, %v402_v27, %v198_v37  ;;  %v205_v41 = vmul.f32 %v192_v38, %v159_v1 }
  0x4a   : > { %v204_v42 = vmul.f32 %v202_v40, %v158_v2  ;;  %v206_v43 = vmul.f32 %v202_v40, %v160_v5 }
  0x4b   : > { %207 = vst [vmem:[%s154_s23] sm:$0xff] %v203_v39 }
  0x4c   : > { %208 = vst [vmem:[%s154_s23 + $0x8] sm:$0xff] %v204_v42 }
  0x4d   : > { %209 = vst [vmem:[%s154_s23 + $0x10] sm:$0xff] %v205_v41 }
  0x4e   : > { %210 = vst [vmem:[%s154_s23 + $0x18] sm:$0xff] %v206_v43 }
  0x4f   : > { %460 = shalt.err (!%p457_p13)
}
  0x50   : > { %s519_s4 = smov 256   ;;  %s520_s5 = smov 16  }
  0x51   : > { %335 = dma.vmem_to_hbm [thread:$0]  (%p582_p9), %s227_s24, 512, %s229_s9, %s212_s25, %s519_s4, %s519_s4, %s520_s5  }
  0x52 PF: > { %s243_s12 = sand.u32 1, %s495_s6   ;;  %p342_p0 = pnand %p319_p12, %p589_p11 }
  0x53   : > { %s244_s13 = scalar_lea.sflag [#allocation4], %s243_s12 }
  0x54   : > { %p343_p1 = pneg %p342_p0 }
  0x56   : > { %490 = dma.done.wait (%p343_p1), %s244_s13, 512  }
  0x57   : > { %492 = vsyncadd (%p343_p1), %s244_s13, 4294966784  ;;  %s17_s11 = sadd.s32 1, %s515_s11   ;;  %s661_s6 = smov %s499_s7 }
  0x58   : > { %p14_p2 = scmp.ge.s32.totalorder %s17_s11, 4   ;;  %s662_s7 = smov %s503_s8 }
  0x59   : > { %s663_s8 = smov %s587_s20  ;;  %s664_s9 = smov %s511_s10 }
  0x5a   : > { %s665_s10 = smov %s667_s14  ;;  %16 = sbr.rel (!%p14_p2) target bundleno = 6 (0x6), region = 69 }
  0x5f   :  { %250 = vsyncpa [#allocation3], 1 }
  0x60   :  { %252 = vsyncpa [#allocation3 + $0x1], 1 }
  0x61   :  { %253 = vsyncpa [#allocation4], 1 }
  0x62   :  { %255 = vsyncpa [#allocation4 + $0x1], 1 }

</bundles_post_ra>
